<compile_context>
chip_gen: v7x
topology: tpu7x:2x2x1
jax: 0.10.0
libtpu: 0.0.40
codegen_flags: <defaults>
</compile_context>

<pallas_src>
import jax
import jax.numpy as jnp
from jax.experimental import pallas as pl
from jax.experimental.pallas import tpu as pltpu


def _gmm_partial_kernel(params_ref, x_ref, out_ref):
    # params_ref: SMEM (6,) f32: [mu1, mu2, k1, k2, w1, w2]
    # x_ref:      VMEM (block_rows, lane_w) tile of the (padded) flattened x
    # out_ref:    VMEM (1, 8, lane_w) f32 per-(sublane, lane) partial sums of log(p+1e-10)
    mu1 = params_ref[0]
    mu2 = params_ref[1]
    k1 = params_ref[2]
    k2 = params_ref[3]
    w1 = params_ref[4]
    w2 = params_ref[5]

    x = x_ref[...].astype(jnp.float32)
    d1 = x - mu1
    d2 = x - mu2
    # p = 0.5*N1 + 0.5*N2 with the 0.5 mixture weights folded into w1/w2.
    p = w1 * jnp.exp(k1 * (d1 * d1)) + w2 * jnp.exp(k2 * (d2 * d2))
    logp = jnp.log(p + 1e-10)          # keeps the reference's floor semantics

    br, lw = logp.shape
    # Reduce the row groups down to 8 sublanes: pure VALU vreg adds, no XLU.
    out_ref[...] = jnp.sum(logp.reshape(br // 8, 8, lw), axis=0, keepdims=True)


def _ceil_to(a, m):
    return -(-a // m) * m


def _pick_target_block_bytes():
    """~4 MiB blocks on 64 MiB-VMEM parts (v7x), ~8 MiB on 128 MiB parts (v5e/v6e)."""
    vmem_cap = 64 * 1024 * 1024
    try:
        vmem_cap = getattr(pltpu.get_tpu_info(), "vmem_capacity_bytes", vmem_cap)
    except Exception:
        pass
    return 8 * 1024 * 1024 if vmem_cap >= 100 * 1024 * 1024 else 4 * 1024 * 1024


def _plan_tiling(n, itemsize, target_block_bytes):
    """Plan a padded lane-dense view: returns (rows, lane_w, block_rows, num_tiles)."""
    lane_w = 512 if n >= 8 * 512 else 128
    rows = _ceil_to(-(-n // lane_w), 8)          # rows needed, rounded to a sublane multiple
    max_block_rows = max(8, (target_block_bytes // (lane_w * itemsize)) // 8 * 8)
    if rows <= 32:
        # Tiny input: one block; pipelining / megacore sharding is irrelevant here.
        return rows, lane_w, rows, 1
    # >= 4 tiles so the BlockSpec pipeline overlaps HBM->VMEM DMA with VPU/EUP work,
    # and an even count so the "parallel" axis splits evenly across v7x's two TCs.
    num_tiles = max(4, -(-rows // max_block_rows))
    num_tiles += num_tiles % 2
    block_rows = _ceil_to(-(-rows // num_tiles), 8)
    rows = block_rows * num_tiles
    return rows, lane_w, block_rows, num_tiles


def gaussian_mixture_loss(x, s1, s2, mu1=0.75, mu2=0.25, variance_penalty=0.001):
    """Pallas implementation of GaussianMixtureModel.forward for x of shape (B, D)."""
    B = x.shape[0]
    n = x.size

    rows, lane_w, block_rows, num_tiles = _plan_tiling(
        n, x.dtype.itemsize, _pick_target_block_bytes())
    pad = rows * lane_w - n

    x_flat = x.reshape(-1)
    if pad:
        # Awkward element counts: zero-pad to the lane-dense tiled view; the exact
        # contribution of the pad elements is subtracted from the sum below.
        x_flat = jnp.pad(x_flat, (0, pad))
    x_view = x_flat.reshape(rows, lane_w)

    # Hoisted per-component coefficients (all scalar math stays out of the kernel):
    #   0.5 * N_i(x) = w_i * exp(k_i * (x - mu_i)^2)
    r1 = jnp.exp(s1).astype(jnp.float32)
    r2 = jnp.exp(s2).astype(jnp.float32)
    two_pi = jnp.float32(2.0 * jnp.pi)
    k1 = -0.5 / r1
    k2 = -0.5 / r2
    w1 = jnp.float32(0.5) / jnp.sqrt(two_pi * r1)
    w2 = jnp.float32(0.5) / jnp.sqrt(two_pi * r2)
    params = jnp.stack([jnp.float32(mu1), jnp.float32(mu2), k1, k2, w1, w2]
                       ).astype(jnp.float32)

    block_bytes = block_rows * lane_w * x.dtype.itemsize
    # 2x double-buffered x blocks + output/params + slack; floor for tiny inputs.
    vmem_limit = int(max(16 * 1024 * 1024, 2 * block_bytes + 4 * 1024 * 1024))

    partials = pl.pallas_call(
        _gmm_partial_kernel,
        out_shape=jax.ShapeDtypeStruct((num_tiles, 8, lane_w), jnp.float32),
        grid_spec=pltpu.PrefetchScalarGridSpec(
            num_scalar_prefetch=0,
            grid=(num_tiles,),
            in_specs=[
                pl.BlockSpec(memory_space=pltpu.SMEM),                  # params (scalars)
                pl.BlockSpec((block_rows, lane_w), lambda i: (i, 0)),   # x tile
            ],
            out_specs=pl.BlockSpec((1, 8, lane_w), lambda i: (i, 0, 0)),
        ),
        compiler_params=pltpu.CompilerParams(
            dimension_semantics=("parallel",),
            vmem_limit_bytes=vmem_limit,
        ),
    )(params, x_view)

    # Tiny final reduce of the independent per-tile partials in plain JAX.
    log_sum = jnp.sum(partials)
    if pad:
        # Remove the (known, constant) contribution of the zero-padded elements.
        d1p = jnp.float32(0.0) - jnp.float32(mu1)
        d2p = jnp.float32(0.0) - jnp.float32(mu2)
        p_pad = w1 * jnp.exp(k1 * d1p * d1p) + w2 * jnp.exp(k2 * d2p * d2p)
        logp_pad = jnp.log(p_pad + jnp.float32(1e-10))
        log_sum = log_sum - jnp.float32(pad) * logp_pad

    # mean over batch of nll = -(sum over all elements) / B
    mean_nll = -log_sum / jnp.float32(B)
    variance_control = 1.0 / (r1 + 1e-6) + 1.0 / (r2 + 1e-6)
    return mean_nll + jnp.float32(variance_penalty) * jnp.mean(variance_control)


def _reference_loss(x, s1, s2, mu1=0.75, mu2=0.25, variance_penalty=0.001):
    r1 = jnp.exp(s1)
    r2 = jnp.exp(s2)
    a = 0.5
    n1 = 1.0 / jnp.sqrt(2 * jnp.pi * r1) * jnp.exp(-0.5 * (x - mu1) ** 2 / r1)
    n2 = 1.0 / jnp.sqrt(2 * jnp.pi * r2) * jnp.exp(-0.5 * (x - mu2) ** 2 / r2)
    p = a * n1 + (1 - a) * n2
    nll = -jnp.sum(jnp.log(p + 1e-10), axis=1)
    variance_control = 1.0 / (r1 + 1e-6) + 1.0 / (r2 + 1e-6)
    return jnp.mean(nll) + variance_penalty * jnp.mean(variance_control)


if __name__ == "__main__":
    # Deterministic parameter init, matching the module's __init__:
    #   s1 = s2 = log(0.25), b = 0.0 (b is unused in forward), mu1=0.75, mu2=0.25
    s1 = jnp.log(jnp.float32(0.25))
    s2 = jnp.log(jnp.float32(0.25))

    key = jax.random.PRNGKey(0)
    k1, k2 = jax.random.split(key)

    # Small shape consistent with the module's (batch, feature) layout.
    B, D = 8, 256
    x = jax.random.uniform(k1, (B, D), dtype=jnp.float32)
    loss = jax.block_until_ready(gaussian_mixture_loss(x, s1, s2))
    ref = _reference_loss(x, s1, s2)
    assert jnp.allclose(loss, ref, rtol=1e-4, atol=1e-3), (loss, ref)

    # An awkwardly-sized case exercising the multi-tile grid and the
    # zero-pad / contribution-subtraction path.
    B2, D2 = 32, 600
    x2 = jax.random.uniform(k2, (B2, D2), dtype=jnp.float32)
    loss2 = jax.block_until_ready(gaussian_mixture_loss(x2, s1, s2))
    ref2 = _reference_loss(x2, s1, s2)
    assert jnp.allclose(loss2, ref2, rtol=1e-4, atol=1e-3), (loss2, ref2)

    print("KERNEL_OK")
</pallas_src>

<mosaic_0001>
module attributes {stable_mosaic.version = 11 : i64} {
  func.func @_gmm_partial_kernel(%arg0: i32, %arg1: memref<6xf32, #tpu.memory_space<smem>>, %arg2: memref<16x128xf32, #tpu.memory_space<vmem>>, %arg3: memref<1x8x128xf32, #tpu.memory_space<vmem>>) attributes {dimension_semantics = [#tpu.dimension_semantics<parallel>], iteration_bounds = array<i64: 1>, scalar_prefetch = 0 : i64, scratch_operands = 0 : i64, tpu.core_type = #tpu.core_type<tc>, window_params = [{transform_indices = @transform_0, window_bounds = array<i64: 6>}, {transform_indices = @transform_1, window_bounds = array<i64: 16, 128>}, {transform_indices = @transform_2, window_bounds = array<i64: 1, 8, 128>}]} {
    %c0 = arith.constant 0 : index
    %0 = memref.load %arg1[%c0] : memref<6xf32, #tpu.memory_space<smem>>
    %c1 = arith.constant 1 : index
    %1 = memref.load %arg1[%c1] : memref<6xf32, #tpu.memory_space<smem>>
    %c2 = arith.constant 2 : index
    %2 = memref.load %arg1[%c2] : memref<6xf32, #tpu.memory_space<smem>>
    %c3 = arith.constant 3 : index
    %3 = memref.load %arg1[%c3] : memref<6xf32, #tpu.memory_space<smem>>
    %c4 = arith.constant 4 : index
    %4 = memref.load %arg1[%c4] : memref<6xf32, #tpu.memory_space<smem>>
    %c5 = arith.constant 5 : index
    %5 = memref.load %arg1[%c5] : memref<6xf32, #tpu.memory_space<smem>>
    %c0_0 = arith.constant 0 : index
    %c0_1 = arith.constant 0 : index
    %6 = vector.load %arg2[%c0_0, %c0_1] : memref<16x128xf32, #tpu.memory_space<vmem>>, vector<16x128xf32>
    %7 = vector.broadcast %0 : f32 to vector<16x128xf32>
    %8 = arith.subf %6, %7 : vector<16x128xf32>
    %9 = vector.broadcast %1 : f32 to vector<16x128xf32>
    %10 = arith.subf %6, %9 : vector<16x128xf32>
    %11 = arith.mulf %8, %8 : vector<16x128xf32>
    %12 = vector.broadcast %2 : f32 to vector<16x128xf32>
    %13 = arith.mulf %12, %11 : vector<16x128xf32>
    %14 = math.exp %13 : vector<16x128xf32>
    %15 = vector.broadcast %4 : f32 to vector<16x128xf32>
    %16 = arith.mulf %15, %14 : vector<16x128xf32>
    %17 = arith.mulf %10, %10 : vector<16x128xf32>
    %18 = vector.broadcast %3 : f32 to vector<16x128xf32>
    %19 = arith.mulf %18, %17 : vector<16x128xf32>
    %20 = math.exp %19 : vector<16x128xf32>
    %21 = vector.broadcast %5 : f32 to vector<16x128xf32>
    %22 = arith.mulf %21, %20 : vector<16x128xf32>
    %23 = arith.addf %16, %22 : vector<16x128xf32>
    %cst = arith.constant 1.000000e-10 : f32
    %24 = vector.broadcast %cst : f32 to vector<16x128xf32>
    %25 = arith.addf %23, %24 : vector<16x128xf32>
    %26 = math.log %25 : vector<16x128xf32>
    %27 = vector.shape_cast %26 : vector<16x128xf32> to vector<2x8x128xf32>
    %cst_2 = arith.constant dense<0.000000e+00> : vector<8x128xf32>
    %28 = vector.multi_reduction <add>, %27, %cst_2 [0] : vector<2x8x128xf32> to vector<8x128xf32>
    %29 = vector.shape_cast %28 : vector<8x128xf32> to vector<1x8x128xf32>
    %c0_3 = arith.constant 0 : index
    %c0_4 = arith.constant 0 : index
    %c0_5 = arith.constant 0 : index
    %30 = vector.load %arg3[%c0_3, %c0_4, %c0_5] : memref<1x8x128xf32, #tpu.memory_space<vmem>>, vector<1x8x128xf32>
    tpu.vector_store %arg3[%c0_3, %c0_4, %c0_5], %29 {strides = array<i32>} : memref<1x8x128xf32, #tpu.memory_space<vmem>>, vector<1x8x128xf32>,
    return
  }
  func.func @transform_0(%arg0: i32) -> i32 {
    %c0_i32 = arith.constant 0 : i32
    %c0_i32_0 = arith.constant 0 : i32
    return %c0_i32 : i32
  }
  func.func @transform_1(%arg0: i32) -> (i32, i32) {
    %c0_i32 = arith.constant 0 : i32
    %c0_i32_0 = arith.constant 0 : i32
    return %arg0, %c0_i32 : i32, i32
  }
  func.func @transform_2(%arg0: i32) -> (i32, i32, i32) {
    %c0_i32 = arith.constant 0 : i32
    %c0_i32_0 = arith.constant 0 : i32
    %c0_i32_1 = arith.constant 0 : i32
    return %arg0, %c0_i32, %c0_i32_0 : i32, i32, i32
  }
}

</mosaic_0001>

<bundles_post_ra>
// kernel: tpu_custom_call.1
= control target key start
LH: loop header
LB: loop body
LE: loop exit
PB: predicated region body
PF: predicated region fallthrough
CT: control target
= control target key end

     0   :  { %7 = vsyncpa [#allocation5], 0  ;;  %s239_s0 = inlined_call_operand.hbm [shape: f32[6], index: 0, kind: input, shape index: {}]   ;;  %s240_s1 = inlined_call_operand.hbm [shape: f32[16,128], index: 1, kind: input, shape index: {}]   ;;  %s241_s2 = inlined_call_operand.hbm [shape: f32[1,8,128], index: 2, kind: output, shape index: {}]  }
   0x1   :  { %8 = vsyncpa [#allocation3], 0 }
   0x2   :  { %9 = vsyncpa [#allocation4], 0  ;;  %s123_s11 = scalar_lea.hbm %s239_s0, 16 }
   0x3   :  { %p124_p0 = scmp.ne.s32.totalorder %s239_s0, %s123_s11  ;;  %p127_p1 = scmp.lt.u32.totalorder %s123_s11, %s239_s0 }
   0x5   :  { %p129_p2 = pnand %p127_p1, %p124_p0 }
   0x7   :  { %132 = shalt.err (!%p129_p2)
}
   0x8   :  { %s183_s16 = smov [#allocation2]   ;;  %s184_s19 = smov [#allocation6]  }
   0x9   :  { %17 = dma.hbm_to_smem %s239_s0, 16, %s183_s16, [#allocation5]  }
   0xa   :  { %s23_s20 = sshll.u32 %s184_s19, 4  ;;  %s133_s23 = scalar_lea.hbm %s240_s1, 256  ;;  %s24_s20 = int_to_ptr.vmem [resolvable:$true] %s23_s20 }
   0xb   :  { %p134_p3 = scmp.ne.s32.totalorder %s240_s1, %s133_s23  ;;  %p137_p4 = scmp.lt.u32.totalorder %s133_s23, %s240_s1 }
   0xd   :  { %p139_p5 = pnand %p137_p4, %p134_p3 }
   0xf   :  { %142 = shalt.err (!%p139_p5)
}
  0x10   :  { %s143_s28 = scalar_lea.vmem %s24_s20, 256  ;;  %p148_p7 = scmp.lt.s32.totalorder %s24_s20, %s24_s20 }
  0x11   :  { %p144_p6 = scmp.ne.s32.totalorder %s24_s20, %s143_s28  ;;  %p149_p8 = scmp.lt.s32.totalorder %s143_s28, %s143_s28 }
  0x13   :  { %p150_p9 = por %p149_p8, %p148_p7 }
  0x15   :  { %p151_p10 = pnand %p150_p9, %p144_p6 }
  0x17   :  { %154 = shalt.err (!%p151_p10)
}
  0x18   :  { %s185_s0 = smov 128   ;;  %s186_s29 = smov 8  }
  0x19   :  { %29 = dma.hbm_to_vmem [thread:$0]  %s240_s1, 256, %s24_s20, [#allocation3], %s185_s0, %s185_s0, %s186_s29  }
  0x1a   :  { %177 = dma.done.wait [#allocation5], 16  }
  0x1b   :  { %178 = vsyncadd [#allocation5], 4294967280 }
  0x1c   :  { %179 = dma.done.wait [#allocation3], 256  }
  0x1d   :  { %180 = vsyncadd [#allocation3], 4294967040 }
  0x1e   :  { %36 = sfence }
  0x1f   :  { %s37_s4 = sld [smem:[#allocation2]]  ;;  %s101_s5 = sld [smem:[#allocation2 + $0x1]]  ;;  %v43_v0 = vld [vmem:[#allocation6] sm:$0xff]  ;;  %v44_v1 = vld [vmem:[#allocation6 + $0x8] sm:$0xff] }
  0x20   :  { %s102_s6 = sld [smem:[#allocation2 + $0x2]]  ;;  %s103_s7 = sld [smem:[#allocation2 + $0x3]] }
  0x21   :  { %s104_s1 = sld [smem:[#allocation2 + $0x4]]  ;;  %s105_s8 = sld [smem:[#allocation2 + $0x5]] }
  0x22   :  { %s187_s9 = smov [#allocation7]  }
  0x23   :  { %s91_s10 = sshll.u32 %s187_s9, 4  ;;  %s92_s10 = int_to_ptr.vmem [resolvable:$true] %s91_s10 }
  0x24   :  { %s155_s11 = scalar_lea.vmem %s92_s10, 128  ;;  %p160_p12 = scmp.lt.s32.totalorder %s92_s10, %s92_s10 }
  0x25   :  { %v45_v2 = vstv %s37_s4  ;;  %v48_v3 = vstv %s101_s5  ;;  %p156_p11 = scmp.ne.s32.totalorder %s92_s10, %s155_s11  ;;  %p161_p13 = scmp.lt.s32.totalorder %s155_s11, %s155_s11 }
  0x26   :  { %v46_v4 = vsub.f32 %v43_v0, %v45_v2  ;;  %v47_v5 = vsub.f32 %v44_v1, %v45_v2  ;;  %v49_v6 = vsub.f32 %v43_v0, %v48_v3  ;;  %v50_v7 = vsub.f32 %v44_v1, %v48_v3 }
  0x27   :  { %v53_v8 = vstv %s102_s6  ;;  %v65_v9 = vstv %s103_s7  ;;  %v60_v22 = vstv %s104_s1  ;;  %v72_v24 = vstv %s105_s8  ;;  %p162_p0 = por %p161_p13, %p160_p12 }
  0x28   :  { %v51_v10 = vmul.f32 %v46_v4, %v46_v4  ;;  %v52_v11 = vmul.f32 %v47_v5, %v47_v5  ;;  %v63_v12 = vmul.f32 %v49_v6, %v49_v6  ;;  %v64_v13 = vmul.f32 %v50_v7, %v50_v7 }
  0x29   :  { %p163_p1 = pnand %p162_p0, %p156_p11 }
  0x2a   :  { %v54_v14 = vmul.f32 %v53_v8, %v51_v10  ;;  %v55_v15 = vmul.f32 %v53_v8, %v52_v11  ;;  %v66_v16 = vmul.f32 %v65_v9, %v63_v12  ;;  %v67_v17 = vmul.f32 %v65_v9, %v64_v13 }
  0x2c   :  { %v56_v18 = vmul.f32 1.442695, %v54_v14  ;;  %v58_v19 = vmul.f32 1.442695, %v55_v15  ;;  %v68_v20 = vmul.f32 1.442695, %v66_v16 }
  0x2d   :  { %v70_v21 = vmul.f32 1.442695, %v67_v17 }
  0x2e   :  { %111 = vpow2.f32 %v56_v18 }
  0x2f   :  { %113 = vpow2.f32 %v58_v19 }
  0x30   :  { %115 = vpow2.f32 %v68_v20 }
  0x31   :  { %117 = vpow2.f32 %v70_v21 }
  0x38   :  { %v112_v23 = vpop.eup %111 }
  0x39   :  { %v114_v25 = vpop.eup %113  ;;  %v61_v26 = vmul.f32 %v112_v23, %v60_v22 }
  0x3a   :  { %v116_v27 = vpop.eup %115  ;;  %v62_v28 = vmul.f32 %v114_v25, %v60_v22 }
  0x3b   :  { %v118_v29 = vpop.eup %117  ;;  %v73_v30 = vmul.f32 %v116_v27, %v72_v24 }
  0x3c   :  { %v74_v31 = vmul.f32 %v118_v29, %v72_v24 }
  0x3d   :  { %v75_v32 = vadd.f32 %v73_v30, %v61_v26 }
  0x3e   :  { %v76_v33 = vadd.f32 %v74_v31, %v62_v28 }
  0x3f   :  { %v77_v34 = vadd.f32 1e-10, %v75_v32 }
  0x40   :  { %v78_v35 = vadd.f32 1e-10, %v76_v33 }
  0x41   :  { %119 = vlog2.f32 %v77_v34 }
  0x42   :  { %121 = vlog2.f32 %v78_v35 }
  0x4b   :  { %v120_v36 = vpop.eup %119 }
  0x4c   :  { %v122_v37 = vpop.eup %121  ;;  %v80_v38 = vmul.f32 0.6931472, %v120_v36 }
  0x4d   :  { %v82_v39 = vmul.f32 0.6931472, %v122_v37 }
  0x4f   :  { %v83_v40 = vadd.f32 %v82_v39, %v80_v38 }
  0x51   :  { %84 = vst [vmem:[#allocation7] sm:$0xff] %v83_v40 }
  0x52   :  { %166 = shalt.err (!%p163_p1)
}
  0x53   :  { %s167_s14 = scalar_lea.hbm %s241_s2, 128 }
  0x54   :  { %p168_p2 = scmp.ne.s32.totalorder %s241_s2, %s167_s14  ;;  %p171_p3 = scmp.lt.u32.totalorder %s167_s14, %s241_s2 }
  0x56   :  { %p173_p4 = pnand %p171_p3, %p168_p2 }
  0x58   :  { %176 = shalt.err (!%p173_p4)
}
  0x59   :  { %94 = dma.vmem_to_hbm [thread:$0]  %s92_s10, 128, %s241_s2, [#allocation4]  }
  0x5a   :  { %181 = dma.done.wait [#allocation4], 128  }
  0x5b   :  { %182 = vsyncadd [#allocation4], 4294967168 }
  0x5c   :  { %98 = vsyncpa [#allocation3], 1 }
  0x5d   :  { %99 = vsyncpa [#allocation4], 1 }
  0x5e   :  { %100 = vsyncpa [#allocation5], 1 }

</bundles_post_ra>
